<compile_context>
chip_gen: v7x
topology: tpu7x:2x2x1
jax: 0.10.0
libtpu: 0.0.40
codegen_flags: <defaults>
</compile_context>

<pallas_src>
import math

import jax
import jax.numpy as jnp
from jax.experimental import pallas as pl
from jax.experimental.pallas import tpu as pltpu


def token_embed_kernel(x_ref, w_ref, o_ref):
    """x_ref: (TM, 3C) bf16 tap-concat rows; w_ref: (3C, Dp) bf16 flattened
    conv weight; o_ref: (TM, Dp) output tile.  One MXU matmul, f32 accumulate."""
    o_ref[...] = jnp.dot(
        x_ref[...], w_ref[...], preferred_element_type=jnp.float32
    ).astype(o_ref.dtype)


def _round_up(x, m):
    return ((x + m - 1) // m) * m


def _vmem_need(tm, c3, d, out_itemsize):
    """Per-step VMEM bytes for a row tile of TM rows."""
    need = 2 * tm * c3 * 2              # bf16 input block, double-buffered
    need += 2 * tm * d * out_itemsize   # output block, double-buffered
    need += 2 * c3 * d * 2              # bf16 weights (constant index_map)
    need += tm * d * 4                  # in-kernel f32 matmul accumulator
    need += tm * d * out_itemsize       # cast temp before the store
    return need


def _vmem_budget_and_limit():
    """(tile-chooser budget, vmem_limit_bytes) sized per TPU generation."""
    vmem_bytes = 64 << 20               # conservative default (v7x-class)
    try:
        info = pltpu.get_tpu_info()
        cap = getattr(info, "vmem_capacity_bytes", None)
        if cap:
            vmem_bytes = int(cap)
    except Exception:
        pass
    if vmem_bytes >= (100 << 20):       # 128 MiB VMEM parts (v5e / v6e)
        return 48 << 20, 64 << 20
    return 24 << 20, 32 << 20           # 64 MiB VMEM parts (v7x)


def _choose_row_tile(n_rows, c3, d, out_itemsize, budget, max_rows_per_tile=None):
    """Largest row tile TM (multiple of 16) whose per-step VMEM need fits the
    budget; then rebalanced so the last tile wastes minimal padding."""
    cap = _round_up(max(n_rows, 16), 16)
    if max_rows_per_tile is not None:
        cap = min(cap, max(16, _round_up(max_rows_per_tile, 16)))

    tm = 16
    while tm * 2 <= cap and _vmem_need(tm * 2, c3, d, out_itemsize) <= budget:
        tm *= 2
    # If the whole (capped) row range fits in one block, take it directly.
    if _vmem_need(cap, c3, d, out_itemsize) <= budget:
        tm = cap

    # Keep the same number of grid steps but spread rows evenly to minimize
    # padding waste in the final tile.
    n_tiles = -(-n_rows // tm)
    tm = min(tm, _round_up(-(-n_rows // n_tiles), 16))
    return max(tm, 16)


def token_embedding(x, w, *, out_dtype=None, max_rows_per_tile=None):
    """x: (B, L, C) float; w: (3, C, D) conv taps (tap, in, out).

    Returns (B, L, D), matching TokenEmbedding.forward.  out_dtype defaults to
    x.dtype; pass jnp.bfloat16 to halve the dominant output HBM traffic."""
    B, L, C = x.shape
    K, Cw, D = w.shape
    assert K == 3 and Cw == C
    out_dtype = jnp.dtype(x.dtype if out_dtype is None else out_dtype)
    out_itemsize = out_dtype.itemsize

    # bf16 DMA path; the MXU accumulates in f32 inside the kernel.
    xb = x.astype(jnp.bfloat16)
    wb = w.astype(jnp.bfloat16)

    # Tap concat along channels:  row l -> [x[l-1], x[l], x[l+1]]  (circular).
    # Matches w.reshape(3C, D) row order (tap-major, channel-minor).
    x_prev = jnp.roll(xb, 1, axis=1)     # x[(l-1) mod L]  -> tap k=0
    x_next = jnp.roll(xb, -1, axis=1)    # x[(l+1) mod L]  -> tap k=2
    x_tap = jnp.concatenate([x_prev, xb, x_next], axis=-1)    # (B, L, 3C)
    c3 = 3 * C
    w_flat = wb.reshape(c3, D)

    # Lane-pad D so output stores are unmasked full-lane vst.
    d_pad = _round_up(D, 128)
    if d_pad != D:
        w_flat = jnp.pad(w_flat, ((0, 0), (0, d_pad - D)))

    # Fold batch and sequence into one row axis; the circular structure is
    # already baked into the 3C axis so every row is independent.
    n_rows = B * L
    rows = x_tap.reshape(n_rows, c3)

    budget, vmem_limit = _vmem_budget_and_limit()
    tm = _choose_row_tile(n_rows, c3, d_pad, out_itemsize, budget,
                          max_rows_per_tile)
    n_tiles = -(-n_rows // tm)
    rows_pad = n_tiles * tm
    if rows_pad != n_rows:
        rows = jnp.pad(rows, ((0, rows_pad - n_rows), (0, 0)))

    out = pl.pallas_call(
        token_embed_kernel,
        out_shape=jax.ShapeDtypeStruct((rows_pad, d_pad), out_dtype),
        grid_spec=pltpu.PrefetchScalarGridSpec(
            num_scalar_prefetch=0,
            grid=(n_tiles,),
            in_specs=[
                # (TM, 3C): TM multiple of 16, last dim == full array dim.
                pl.BlockSpec((tm, c3), lambda i: (i, 0)),
                # Resident weights (constant index_map -> no per-step re-DMA).
                pl.BlockSpec((c3, d_pad), lambda i: (0, 0)),
            ],
            out_specs=pl.BlockSpec((tm, d_pad), lambda i: (i, 0)),
        ),
        compiler_params=pltpu.CompilerParams(
            dimension_semantics=("parallel",),
            vmem_limit_bytes=vmem_limit,
        ),
    )(rows, w_flat)

    return out[:n_rows, :D].reshape(B, L, D)


def init_token_embedding_weights(key, c_in, d_model):
    """Kaiming-normal (fan_in, leaky_relu) init of Conv1d weight (D, C, 3),
    returned already transposed to kernel layout (3, C, D)."""
    fan_in = c_in * 3
    gain = math.sqrt(2.0)                       # leaky_relu, a=0 (PyTorch default)
    std = gain / math.sqrt(fan_in)
    w_torch_layout = std * jax.random.normal(key, (d_model, c_in, 3), jnp.float32)
    return jnp.transpose(w_torch_layout, (2, 1, 0))   # (D, C, K) -> (K, C, D)


def reference(x, w):
    """Pure-JAX circular-conv reference on the same bf16-rounded operands
    (independent code path, f32 accumulation)."""
    B, L, C = x.shape
    xb = x.astype(jnp.bfloat16).astype(jnp.float32)
    wb = w.astype(jnp.bfloat16).astype(jnp.float32)
    xp = jnp.concatenate([xb[:, -1:], xb, xb[:, :1]], axis=1)   # (B, L+2, C)
    out = jnp.zeros((B, L, wb.shape[-1]), jnp.float32)
    for k in range(3):
        out = out + jnp.einsum("blc,cd->bld", xp[:, k:k + L], wb[k],
                               preferred_element_type=jnp.float32)
    return out


if __name__ == "__main__":
    key = jax.random.PRNGKey(0)
    kx, kw, kx2, kw2 = jax.random.split(key, 4)

    # --- Test 1: lane-aligned d_model, exercise single-tile and multi-tile ---
    B, L, C, D = 2, 64, 4, 128
    x = jax.random.normal(kx, (B, L, C), jnp.float32)
    w = init_token_embedding_weights(kw, C, D)
    ref = reference(x, w)

    out_full = jax.block_until_ready(token_embedding(x, w))
    out_tiled = jax.block_until_ready(
        token_embedding(x, w, max_rows_per_tile=32))   # 4 row tiles
    assert out_full.shape == (B, L, D), out_full.shape
    assert out_tiled.shape == (B, L, D), out_tiled.shape
    assert jnp.allclose(out_full, ref, atol=1e-3, rtol=1e-3), "full mismatch"
    assert jnp.allclose(out_tiled, ref, atol=1e-3, rtol=1e-3), "tiled mismatch"

    # bf16 output path (halves the dominant output write traffic).
    out_bf16 = jax.block_until_ready(
        token_embedding(x, w, out_dtype=jnp.bfloat16))
    assert jnp.allclose(out_bf16.astype(jnp.float32), ref, atol=5e-2, rtol=5e-2), \
        "bf16-out mismatch"

    # --- Test 2: non-lane-aligned D and non-multiple-of-16 B*L (padding paths) ---
    B2, L2, C2, D2 = 3, 10, 5, 96
    x2 = jax.random.normal(kx2, (B2, L2, C2), jnp.float32)
    w2 = init_token_embedding_weights(kw2, C2, D2)
    ref2 = reference(x2, w2)
    out2 = jax.block_until_ready(token_embedding(x2, w2))
    assert out2.shape == (B2, L2, D2), out2.shape
    assert jnp.allclose(out2, ref2, atol=1e-3, rtol=1e-3), "padded-case mismatch"

    print("KERNEL_OK")
</pallas_src>

<mosaic_0001>
module attributes {stable_mosaic.version = 11 : i64} {
  func.func @token_embed_kernel(%arg0: i32, %arg1: memref<128x12xbf16, #tpu.memory_space<vmem>>, %arg2: memref<12x128xbf16, #tpu.memory_space<vmem>>, %arg3: memref<128x128xf32, #tpu.memory_space<vmem>>) attributes {dimension_semantics = [#tpu.dimension_semantics<parallel>], iteration_bounds = array<i64: 1>, scalar_prefetch = 0 : i64, scratch_operands = 0 : i64, tpu.core_type = #tpu.core_type<tc>, window_params = [{transform_indices = @transform_0, window_bounds = array<i64: 128, 12>}, {pipeline_mode = #tpu.pipeline_mode<synchronous>, transform_indices = @transform_1, window_bounds = array<i64: 12, 128>}, {transform_indices = @transform_2, window_bounds = array<i64: 128, 128>}]} {
    %c0 = arith.constant 0 : index
    %c0_0 = arith.constant 0 : index
    %0 = vector.load %arg1[%c0, %c0_0] : memref<128x12xbf16, #tpu.memory_space<vmem>>, vector<128x12xbf16>
    %c0_1 = arith.constant 0 : index
    %c0_2 = arith.constant 0 : index
    %1 = vector.load %arg2[%c0_1, %c0_2] : memref<12x128xbf16, #tpu.memory_space<vmem>>, vector<12x128xbf16>
    %cst = arith.constant dense<0.000000e+00> : vector<128x128xf32>
    %2 = tpu.matmul %0, %1, %cst {dimension_numbers = #tpu.dot_dimension_numbers<[1], [0], [0], [1], [0, 0, 1, 1], [], []>} : vector<128x12xbf16>, vector<12x128xbf16>, vector<128x128xf32> -> vector<128x128xf32>
    %c0_3 = arith.constant 0 : index
    %c0_4 = arith.constant 0 : index
    %3 = vector.load %arg3[%c0_3, %c0_4] : memref<128x128xf32, #tpu.memory_space<vmem>>, vector<128x128xf32>
    tpu.vector_store %arg3[%c0_3, %c0_4], %2 {strides = array<i32>} : memref<128x128xf32, #tpu.memory_space<vmem>>, vector<128x128xf32>,
    return
  }
  func.func @transform_0(%arg0: i32) -> (i32, i32) {
    %c0_i32 = arith.constant 0 : i32
    %c0_i32_0 = arith.constant 0 : i32
    return %arg0, %c0_i32 : i32, i32
  }
  func.func @transform_1(%arg0: i32) -> (i32, i32) {
    %c0_i32 = arith.constant 0 : i32
    %c0_i32_0 = arith.constant 0 : i32
    %c0_i32_1 = arith.constant 0 : i32
    return %c0_i32, %c0_i32_0 : i32, i32
  }
  func.func @transform_2(%arg0: i32) -> (i32, i32) {
    %c0_i32 = arith.constant 0 : i32
    %c0_i32_0 = arith.constant 0 : i32
    return %arg0, %c0_i32 : i32, i32
  }
}

</mosaic_0001>

<bundles_post_ra>
// kernel: tpu_custom_call.1
= control target key start
LH: loop header
LB: loop body
LE: loop exit
PB: predicated region body
PF: predicated region fallthrough
CT: control target
= control target key end

     0   :  { %vm101_vm0 = vcmask 1045504   ;;  %vm76_vm1 = vcmask 97280   ;;  %s383_s0 = inlined_call_operand.vmem [shape: bf16[128,12], index: 0, kind: input, shape index: {}]   ;;  %s384_s1 = inlined_call_operand.vmem [shape: bf16[12,128], index: 1, kind: input, shape index: {}]   ;;  %s385_s2 = inlined_call_operand.hbm [shape: f32[128,128], index: 2, kind: output, shape index: {}]  }
   0x1   :  { %v285_v0 = vld [vmem:[%s384_s1] sm:$0x3f]   ;;  %v288_v4 = vld [vmem:[%s383_s0 + $0x8] sm:$0xff]   ;;  %v290_v6 = vld [vmem:[%s383_s0 + $0x10] sm:$0xff]  }
   0x2   :  { %v286_v1 = vld [vmem:[%s383_s0] sm:$0xff]   ;;  %280 = vmatprep.subr.msk.bf16.mxu0 %vm101_vm0, %v285_v0  ;;  %281 = vmatprep.subr.msk.bf16.mxu1 %vm101_vm0, %v285_v0  ;;  %v103_v2 = vsel %vm101_vm0, %v285_v0, 0  ;;  %v289_v5 = vld [vmem:[%s383_s0 + $0x28] sm:$0xff]   ;;  %v291_v7 = vld [vmem:[%s383_s0 + $0x30] sm:$0xff]  }
   0x3   :  { %261 = vmatpush3.bf16.msra.mxu0 %v103_v2  ;;  %279 = vmatpush3.bf16.msra.mxu1 %v103_v2  ;;  %v287_v3 = vld [vmem:[%s383_s0 + $0x20] sm:$0xff]  }
   0x4   :  { %262 = vmatprep.mubr.msk.bf16.mxu0 %vm76_vm1, %v286_v1  ;;  %270 = vmatprep.mubr.msk.bf16.mxu1 %vm76_vm1, %v287_v3 }
   0x6   :  { %263 = vmatmul.mubr.msk.bf16.vlgmr.msra.gmra.mrb[0].mxu0 %vm76_vm1, %v288_v4  ;;  %271 = vmatmul.mubr.msk.bf16.vlgmr.msra.gmra.mrb[0].mxu1 %vm76_vm1, %v289_v5 }
   0x7   :  { %266 = vmatprep.mubr.msk.bf16.mxu0 %vm76_vm1, %v290_v6  ;;  %274 = vmatprep.mubr.msk.bf16.mxu1 %vm76_vm1, %v291_v7 }
   0x8   :  { %7 = vsyncpa [#allocation3], 0  ;;  %v292_v8 = vld [vmem:[%s383_s0 + $0x18] sm:$0xff]  }
   0x9   :  { %v293_v9 = vld [vmem:[%s383_s0 + $0x38] sm:$0xff]   ;;  %s318_s0 = smov [#allocation2]  }
   0xa   :  { %s223_s26 = sshll.u32 %s318_s0, 4  ;;  %s224_s26 = int_to_ptr.vmem [resolvable:$true] %s223_s26 }
   0xb   :  { %s294_s27 = scalar_lea.vmem %s224_s26, 2048  ;;  %p299_p1 = scmp.lt.s32.totalorder %s224_s26, %s224_s26 }
   0xc   :  { %p295_p0 = scmp.ne.s32.totalorder %s224_s26, %s294_s27  ;;  %p300_p2 = scmp.lt.s32.totalorder %s294_s27, %s294_s27 }
   0xe   :  { %267 = vmatmul.mubr.msk.bf16.gmra.mrb[4].mxu0 %vm76_vm1, %v292_v8  ;;  %275 = vmatmul.mubr.msk.bf16.gmra.mrb[4].mxu1 %vm76_vm1, %v293_v9  ;;  %p301_p3 = por %p300_p2, %p299_p1 }
  0x10   :  { %p302_p4 = pnand %p301_p3, %p295_p0 }
  0xd9   :  { %v264_v10 = vpop.f32.mrb[0].mxu0  ;;  %v272_v11 = vpop.f32.mrb[0].mxu1 }
  0xda   :  { %204 = vst [vmem:[#allocation2 + $0x10] sm:$0xff] %v264_v10  ;;  %v139_v12 = vpop.f32.mrb[1].mxu0  ;;  %212 = vst [vmem:[#allocation2 + $0x50] sm:$0xff] %v272_v11  ;;  %v171_v13 = vpop.f32.mrb[1].mxu1 }
  0xdb   :  { %202 = vst [vmem:[#allocation2] sm:$0xff] %v139_v12  ;;  %v265_v14 = vpop.f32.mrb[2].mxu0  ;;  %210 = vst [vmem:[#allocation2 + $0x40] sm:$0xff] %v171_v13  ;;  %v273_v15 = vpop.f32.mrb[2].mxu1 }
  0xdc   :  { %205 = vst [vmem:[#allocation2 + $0x18] sm:$0xff] %v265_v14  ;;  %v142_v16 = vpop.f32.mrb[3].mxu0  ;;  %213 = vst [vmem:[#allocation2 + $0x58] sm:$0xff] %v273_v15  ;;  %v174_v17 = vpop.f32.mrb[3].mxu1 }
  0xdd   :  { %203 = vst [vmem:[#allocation2 + $0x8] sm:$0xff] %v142_v16  ;;  %211 = vst [vmem:[#allocation2 + $0x48] sm:$0xff] %v174_v17 }
  0xe1   :  { %v268_v18 = vpop.f32.mrb[4].mxu0  ;;  %v276_v19 = vpop.f32.mrb[4].mxu1 }
  0xe2   :  { %208 = vst [vmem:[#allocation2 + $0x30] sm:$0xff] %v268_v18  ;;  %v155_v20 = vpop.f32.mrb[5].mxu0  ;;  %216 = vst [vmem:[#allocation2 + $0x70] sm:$0xff] %v276_v19  ;;  %v187_v21 = vpop.f32.mrb[5].mxu1 }
  0xe3   :  { %206 = vst [vmem:[#allocation2 + $0x20] sm:$0xff] %v155_v20  ;;  %v269_v22 = vpop.f32.mrb[6].mxu0  ;;  %214 = vst [vmem:[#allocation2 + $0x60] sm:$0xff] %v187_v21  ;;  %v277_v23 = vpop.f32.mrb[6].mxu1 }
  0xe4   :  { %209 = vst [vmem:[#allocation2 + $0x38] sm:$0xff] %v269_v22  ;;  %v158_v24 = vpop.f32.mrb[7].mxu0  ;;  %217 = vst [vmem:[#allocation2 + $0x78] sm:$0xff] %v277_v23  ;;  %v190_v25 = vpop.f32.mrb[7].mxu1 }
  0xe5   :  { %207 = vst [vmem:[#allocation2 + $0x28] sm:$0xff] %v158_v24  ;;  %215 = vst [vmem:[#allocation2 + $0x68] sm:$0xff] %v190_v25 }
  0xe6   :  { %305 = shalt.err (!%p302_p4)
}
  0xe7   :  { %s306_s30 = scalar_lea.hbm %s385_s2, 2048 }
  0xe8   :  { %p307_p5 = scmp.ne.s32.totalorder %s385_s2, %s306_s30  ;;  %p310_p6 = scmp.lt.u32.totalorder %s306_s30, %s385_s2 }
  0xea   :  { %p312_p7 = pnand %p310_p6, %p307_p5 }
  0xec   :  { %315 = shalt.err (!%p312_p7)
}
  0xed   :  { %s319_s7 = smov 128   ;;  %s320_s8 = smov 8  }
  0xee   :  { %229 = dma.vmem_to_hbm [thread:$0]  %s224_s26, 2048, %s385_s2, [#allocation3], %s319_s7, %s319_s7, %s320_s8  }
  0xef   :  { %316 = dma.done.wait [#allocation3], 2048  }
  0xf0   :  { %317 = vsyncadd [#allocation3], 4294965248 }
  0xf1   :  { %233 = vsyncpa [#allocation3], 1 }

</bundles_post_ra>
